<compile_context>
chip_gen: v7x
topology: tpu7x:2x2x1
jax: 0.10.0
libtpu: 0.0.40
codegen_flags: <defaults>
</compile_context>

<pallas_src>
import functools

import jax
import jax.numpy as jnp
from jax.experimental import pallas as pl
from jax.experimental.pallas import tpu as pltpu

K_IN = 784      # 28 * 28
H = 256         # hidden width
K_PAD = 1024    # layer-1 contraction padded to a multiple of 256 (MXU aligned)
LANE = 128      # lane width for the padded output


def _round_up(x, m):
    return (x + m - 1) // m * m


def _mlp_kernel(x_ref, w1_ref, b1_ref, w2_ref, b2_ref, w3_ref, b3_ref, o_ref):
    # Layer 1: Linear(784 -> 256) + ReLU.  bf16 operands, f32 MXU accumulation.
    h1 = jnp.dot(x_ref[...], w1_ref[...], preferred_element_type=jnp.float32)
    h1 = jnp.maximum(h1 + b1_ref[...], 0.0).astype(jnp.bfloat16)
    # Layer 2: Linear(256 -> 256) + ReLU.
    h2 = jnp.dot(h1, w2_ref[...], preferred_element_type=jnp.float32)
    h2 = jnp.maximum(h2 + b2_ref[...], 0.0).astype(jnp.bfloat16)
    # Layer 3: Linear(256 -> n_class_padded), no activation.
    out = jnp.dot(h2, w3_ref[...], preferred_element_type=jnp.float32) + b3_ref[...]
    o_ref[...] = out.astype(o_ref.dtype)


@functools.partial(jax.jit, static_argnames=("block_b",))
def mlp_forward(x, params, block_b=512):
    """x: (B, C, H, W) or (B, 784). Returns logits (B, n_class) in f32."""
    w1, b1, w2, b2, w3, b3 = params
    B = x.shape[0]
    n_class = w3.shape[1]
    n_pad = _round_up(n_class, LANE)

    # Flatten exactly like torch's x.view(B, -1) (row-major).
    x2d = x.reshape(B, -1)
    assert x2d.shape[1] == K_IN

    # Batch tile: multiple of 8 (f32/bf16 sublanes), capped at block_b.
    tb = min(block_b, _round_up(B, 8))
    b_pad = _round_up(B, tb)

    # Pad + cast. Zero rows/cols contribute nothing to the dots.
    x_p = jnp.zeros((b_pad, K_PAD), jnp.bfloat16).at[:B, :K_IN].set(
        x2d.astype(jnp.bfloat16))
    w1_p = jnp.zeros((K_PAD, H), jnp.bfloat16).at[:K_IN, :].set(
        w1.astype(jnp.bfloat16))
    w2_p = w2.astype(jnp.bfloat16)
    w3_p = jnp.zeros((H, n_pad), jnp.bfloat16).at[:, :n_class].set(
        w3.astype(jnp.bfloat16))
    b1_p = b1.reshape(1, H).astype(jnp.float32)
    b2_p = b2.reshape(1, H).astype(jnp.float32)
    b3_p = jnp.zeros((1, n_pad), jnp.float32).at[:, :n_class].set(
        b3.reshape(1, n_class).astype(jnp.float32))

    # Weights / biases: same block every grid step -> stay resident in VMEM.
    resident = lambda shape: pl.BlockSpec(shape, lambda i: (0, 0))

    out = pl.pallas_call(
        _mlp_kernel,
        out_shape=jax.ShapeDtypeStruct((b_pad, n_pad), jnp.float32),
        grid=(b_pad // tb,),
        in_specs=[
            pl.BlockSpec((tb, K_PAD), lambda i: (i, 0)),   # x: tiled over batch
            resident((K_PAD, H)), resident((1, H)),        # w1, b1
            resident((H, H)),     resident((1, H)),        # w2, b2
            resident((H, n_pad)), resident((1, n_pad)),    # w3, b3
        ],
        out_specs=pl.BlockSpec((tb, n_pad), lambda i: (i, 0)),
        compiler_params=pltpu.CompilerParams(
            dimension_semantics=("parallel",)),
    )(x_p, w1_p, b1_p, w2_p, b2_p, w3_p, b3_p)

    return out[:B, :n_class]


def init_params(key, n_class=10):
    """Deterministic init matching nn.Linear's default U(-1/sqrt(in), 1/sqrt(in))."""
    dims = [(784, 256), (256, 256), (256, n_class)]
    params = []
    for i, (fin, fout) in enumerate(dims):
        kw, kb = jax.random.split(jax.random.fold_in(key, i))
        bound = 1.0 / (fin ** 0.5)
        # Stored as (in, out) == transpose of PyTorch's (out, in) weight.
        w = jax.random.uniform(kw, (fin, fout), jnp.float32, -bound, bound)
        b = jax.random.uniform(kb, (1, fout), jnp.float32, -bound, bound)
        params += [w, b]
    return tuple(params)


def _ref_forward(x, params):
    w1, b1, w2, b2, w3, b3 = params
    xf = x.reshape(x.shape[0], -1)
    h = jnp.maximum(xf @ w1 + b1, 0.0)
    h = jnp.maximum(h @ w2 + b2, 0.0)
    return h @ w3 + b3


if __name__ == "__main__":
    key = jax.random.PRNGKey(0)
    params = init_params(key, n_class=10)

    # MNIST-like input: batch=2, NCHW (2, 1, 28, 28) -> flattens to (2, 784).
    x = jax.random.normal(jax.random.fold_in(key, 123), (2, 1, 28, 28), jnp.float32)
    out = jax.block_until_ready(mlp_forward(x, params))
    ref = _ref_forward(x, params)
    assert out.shape == (2, 10)
    # bf16 operands with f32 accumulation -> relaxed tolerance vs f32 reference.
    assert jnp.allclose(out, ref, atol=3e-2, rtol=3e-2), \
        float(jnp.max(jnp.abs(out - ref)))

    # Non-multiple-of-8 batch exercises the batch padding / tiling path.
    x2 = jax.random.normal(jax.random.fold_in(key, 7), (13, 1, 28, 28), jnp.float32)
    out2 = jax.block_until_ready(mlp_forward(x2, params))
    ref2 = _ref_forward(x2, params)
    assert out2.shape == (13, 10)
    assert jnp.allclose(out2, ref2, atol=3e-2, rtol=3e-2)

    print("KERNEL_OK")
</pallas_src>

<mosaic_0001>
module attributes {stable_mosaic.version = 11 : i64} {
  func.func @_mlp_kernel(%arg0: i32, %arg1: memref<8x1024xbf16, #tpu.memory_space<vmem>>, %arg2: memref<1024x256xbf16, #tpu.memory_space<vmem>>, %arg3: memref<1x256xf32, #tpu.memory_space<vmem>>, %arg4: memref<256x256xbf16, #tpu.memory_space<vmem>>, %arg5: memref<1x256xf32, #tpu.memory_space<vmem>>, %arg6: memref<256x128xbf16, #tpu.memory_space<vmem>>, %arg7: memref<1x128xf32, #tpu.memory_space<vmem>>, %arg8: memref<8x128xf32, #tpu.memory_space<vmem>>) attributes {dimension_semantics = [#tpu.dimension_semantics<parallel>], iteration_bounds = array<i64: 1>, scalar_prefetch = 0 : i64, scratch_operands = 0 : i64, tpu.core_type = #tpu.core_type<tc>, window_params = [{transform_indices = @transform_0, window_bounds = array<i64: 8, 1024>}, {pipeline_mode = #tpu.pipeline_mode<synchronous>, transform_indices = @transform_1, window_bounds = array<i64: 1024, 256>}, {pipeline_mode = #tpu.pipeline_mode<synchronous>, transform_indices = @transform_2, window_bounds = array<i64: 1, 256>}, {pipeline_mode = #tpu.pipeline_mode<synchronous>, transform_indices = @transform_3, window_bounds = array<i64: 256, 256>}, {pipeline_mode = #tpu.pipeline_mode<synchronous>, transform_indices = @transform_4, window_bounds = array<i64: 1, 256>}, {pipeline_mode = #tpu.pipeline_mode<synchronous>, transform_indices = @transform_5, window_bounds = array<i64: 256, 128>}, {pipeline_mode = #tpu.pipeline_mode<synchronous>, transform_indices = @transform_6, window_bounds = array<i64: 1, 128>}, {transform_indices = @transform_7, window_bounds = array<i64: 8, 128>}]} {
    %c0 = arith.constant 0 : index
    %c0_0 = arith.constant 0 : index
    %0 = vector.load %arg1[%c0, %c0_0] : memref<8x1024xbf16, #tpu.memory_space<vmem>>, vector<8x1024xbf16>
    %c0_1 = arith.constant 0 : index
    %c0_2 = arith.constant 0 : index
    %1 = vector.load %arg2[%c0_1, %c0_2] : memref<1024x256xbf16, #tpu.memory_space<vmem>>, vector<1024x256xbf16>
    %cst = arith.constant dense<0.000000e+00> : vector<8x256xf32>
    %2 = tpu.matmul %0, %1, %cst {dimension_numbers = #tpu.dot_dimension_numbers<[1], [0], [0], [1], [0, 0, 1, 1], [], []>} : vector<8x1024xbf16>, vector<1024x256xbf16>, vector<8x256xf32> -> vector<8x256xf32>
    %c0_3 = arith.constant 0 : index
    %c0_4 = arith.constant 0 : index
    %3 = vector.load %arg3[%c0_3, %c0_4] : memref<1x256xf32, #tpu.memory_space<vmem>>, vector<1x256xf32>
    %4 = vector.broadcast %3 : vector<1x256xf32> to vector<8x256xf32>
    %5 = arith.addf %2, %4 : vector<8x256xf32>
    %cst_5 = arith.constant 0.000000e+00 : f32
    %6 = vector.broadcast %cst_5 : f32 to vector<8x256xf32>
    %7 = arith.maximumf %5, %6 : vector<8x256xf32>
    %8 = arith.truncf %7 : vector<8x256xf32> to vector<8x256xbf16>
    %c0_6 = arith.constant 0 : index
    %c0_7 = arith.constant 0 : index
    %9 = vector.load %arg4[%c0_6, %c0_7] : memref<256x256xbf16, #tpu.memory_space<vmem>>, vector<256x256xbf16>
    %cst_8 = arith.constant dense<0.000000e+00> : vector<8x256xf32>
    %10 = tpu.matmul %8, %9, %cst_8 {dimension_numbers = #tpu.dot_dimension_numbers<[1], [0], [0], [1], [0, 0, 1, 1], [], []>} : vector<8x256xbf16>, vector<256x256xbf16>, vector<8x256xf32> -> vector<8x256xf32>
    %c0_9 = arith.constant 0 : index
    %c0_10 = arith.constant 0 : index
    %11 = vector.load %arg5[%c0_9, %c0_10] : memref<1x256xf32, #tpu.memory_space<vmem>>, vector<1x256xf32>
    %12 = vector.broadcast %11 : vector<1x256xf32> to vector<8x256xf32>
    %13 = arith.addf %10, %12 : vector<8x256xf32>
    %cst_11 = arith.constant 0.000000e+00 : f32
    %14 = vector.broadcast %cst_11 : f32 to vector<8x256xf32>
    %15 = arith.maximumf %13, %14 : vector<8x256xf32>
    %16 = arith.truncf %15 : vector<8x256xf32> to vector<8x256xbf16>
    %c0_12 = arith.constant 0 : index
    %c0_13 = arith.constant 0 : index
    %17 = vector.load %arg6[%c0_12, %c0_13] : memref<256x128xbf16, #tpu.memory_space<vmem>>, vector<256x128xbf16>
    %cst_14 = arith.constant dense<0.000000e+00> : vector<8x128xf32>
    %18 = tpu.matmul %16, %17, %cst_14 {dimension_numbers = #tpu.dot_dimension_numbers<[1], [0], [0], [1], [0, 0, 1, 1], [], []>} : vector<8x256xbf16>, vector<256x128xbf16>, vector<8x128xf32> -> vector<8x128xf32>
    %c0_15 = arith.constant 0 : index
    %c0_16 = arith.constant 0 : index
    %19 = vector.load %arg7[%c0_15, %c0_16] : memref<1x128xf32, #tpu.memory_space<vmem>>, vector<1x128xf32>
    %20 = vector.broadcast %19 : vector<1x128xf32> to vector<8x128xf32>
    %21 = arith.addf %18, %20 : vector<8x128xf32>
    %c0_17 = arith.constant 0 : index
    %c0_18 = arith.constant 0 : index
    %22 = vector.load %arg8[%c0_17, %c0_18] : memref<8x128xf32, #tpu.memory_space<vmem>>, vector<8x128xf32>
    tpu.vector_store %arg8[%c0_17, %c0_18], %21 {strides = array<i32>} : memref<8x128xf32, #tpu.memory_space<vmem>>, vector<8x128xf32>,
    return
  }
  func.func @transform_0(%arg0: i32) -> (i32, i32) {
    %c0_i32 = arith.constant 0 : i32
    %c0_i32_0 = arith.constant 0 : i32
    return %arg0, %c0_i32 : i32, i32
  }
  func.func @transform_1(%arg0: i32) -> (i32, i32) {
    %c0_i32 = arith.constant 0 : i32
    %c0_i32_0 = arith.constant 0 : i32
    %c0_i32_1 = arith.constant 0 : i32
    return %c0_i32, %c0_i32_0 : i32, i32
  }
  func.func @transform_2(%arg0: i32) -> (i32, i32) {
    %c0_i32 = arith.constant 0 : i32
    %c0_i32_0 = arith.constant 0 : i32
    %c0_i32_1 = arith.constant 0 : i32
    return %c0_i32, %c0_i32_0 : i32, i32
  }
  func.func @transform_3(%arg0: i32) -> (i32, i32) {
    %c0_i32 = arith.constant 0 : i32
    %c0_i32_0 = arith.constant 0 : i32
    %c0_i32_1 = arith.constant 0 : i32
    return %c0_i32, %c0_i32_0 : i32, i32
  }
  func.func @transform_4(%arg0: i32) -> (i32, i32) {
    %c0_i32 = arith.constant 0 : i32
    %c0_i32_0 = arith.constant 0 : i32
    %c0_i32_1 = arith.constant 0 : i32
    return %c0_i32, %c0_i32_0 : i32, i32
  }
  func.func @transform_5(%arg0: i32) -> (i32, i32) {
    %c0_i32 = arith.constant 0 : i32
    %c0_i32_0 = arith.constant 0 : i32
    %c0_i32_1 = arith.constant 0 : i32
    return %c0_i32, %c0_i32_0 : i32, i32
  }
  func.func @transform_6(%arg0: i32) -> (i32, i32) {
    %c0_i32 = arith.constant 0 : i32
    %c0_i32_0 = arith.constant 0 : i32
    %c0_i32_1 = arith.constant 0 : i32
    return %c0_i32, %c0_i32_0 : i32, i32
  }
  func.func @transform_7(%arg0: i32) -> (i32, i32) {
    %c0_i32 = arith.constant 0 : i32
    %c0_i32_0 = arith.constant 0 : i32
    return %arg0, %c0_i32 : i32, i32
  }
}

</mosaic_0001>

<bundles_post_ra>
// kernel: mlp_forward.1
= control target key start
LH: loop header
LB: loop body
LE: loop exit
PB: predicated region body
PF: predicated region fallthrough
CT: control target
= control target key end

     0   :  { %s2529_s1 = inlined_call_operand.vmem [shape: bf16[1024,256], index: 1, kind: input, shape index: {}]   ;;  %s2530_s0 = inlined_call_operand.vmem [shape: bf16[8,1024], index: 0, kind: input, shape index: {}]   ;;  %s2531_s3 = inlined_call_operand.vmem [shape: bf16[256,256], index: 3, kind: input, shape index: {}]   ;;  %s2532_s5 = inlined_call_operand.vmem [shape: bf16[256,128], index: 5, kind: input, shape index: {}]   ;;  %s2533_s2 = inlined_call_operand.vmem [shape: f32[1,256], index: 2, kind: input, shape index: {}]   ;;  %s2534_s4 = inlined_call_operand.vmem [shape: f32[1,256], index: 4, kind: input, shape index: {}]   ;;  %s2535_s6 = inlined_call_operand.vmem [shape: f32[1,128], index: 6, kind: input, shape index: {}]   ;;  %s2536_s7 = inlined_call_operand.vmem [shape: f32[8,128], index: 7, kind: output, shape index: {}]  }
   0x1   :  { %v1655_v0 = vld [vmem:[%s2529_s1 + $0x104] ss:$8 sps:$4 sm:$0xff]   ;;  %v1657_v1 = vld [vmem:[%s2529_s1 + $0x100] ss:$8 sps:$4 sm:$0xff]   ;;  %v1658_v2 = vld [vmem:[%s2529_s1 + $0x114] ss:$8 sps:$4 sm:$0xff]  }
   0x2   :  { %880 = vmatprep.subr.bf16.mxu0 %v1655_v0  ;;  %v1660_v3 = vld [vmem:[%s2529_s1 + $0x110] ss:$8 sps:$4 sm:$0xff]   ;;  %v1661_v4 = vld [vmem:[%s2529_s1 + $0x124] ss:$8 sps:$4 sm:$0xff]   ;;  %v1663_v5 = vld [vmem:[%s2529_s1 + $0x120] ss:$8 sps:$4 sm:$0xff]  }
   0x3   :  { %881 = vmatpush1.bf16.msra.mxu0 %v1657_v1  ;;  %v1664_v6 = vld [vmem:[%s2529_s1 + $0x134] ss:$8 sps:$4 sm:$0xff]   ;;  %v1666_v7 = vld [vmem:[%s2529_s1 + $0x130] ss:$8 sps:$4 sm:$0xff]   ;;  %v1667_v8 = vld [vmem:[%s2529_s1 + $0x144] ss:$8 sps:$4 sm:$0xff]  }
   0x4   :  { %882 = vmatprep.subr.bf16.mxu0 %v1658_v2  ;;  %v1669_v9 = vld [vmem:[%s2529_s1 + $0x140] ss:$8 sps:$4 sm:$0xff]   ;;  %v1670_v10 = vld [vmem:[%s2529_s1 + $0x154] ss:$8 sps:$4 sm:$0xff]   ;;  %v1672_v11 = vld [vmem:[%s2529_s1 + $0x150] ss:$8 sps:$4 sm:$0xff]  }
   0x5   :  { %v1673_v12 = vld [vmem:[%s2529_s1 + $0x164] ss:$8 sps:$4 sm:$0xff]   ;;  %v1675_v15 = vld [vmem:[%s2529_s1 + $0x160] ss:$8 sps:$4 sm:$0xff]   ;;  %v1676_v16 = vld [vmem:[%s2529_s1 + $0x174] ss:$8 sps:$4 sm:$0xff]  }
   0x6   :  { %v2001_v13 = vld [vmem:[%s2530_s0 + $0x8] sm:$0xff]  ;;  %v1678_v17 = vld [vmem:[%s2529_s1 + $0x170] ss:$8 sps:$4 sm:$0xff]   ;;  %v1682_v20 = vld [vmem:[%s2529_s1 + $0x194] ss:$8 sps:$4 sm:$0xff]  }
   0x7   :  { %883 = vmatpush1.bf16.msra.mxu0 %v1660_v3  ;;  %v1439_v14 = vcombine.high %v2001_v13, %v2001_v13  ;;  %v1679_v18 = vld [vmem:[%s2529_s1 + $0x184] ss:$8 sps:$4 sm:$0xff]   ;;  %v1681_v19 = vld [vmem:[%s2529_s1 + $0x180] ss:$8 sps:$4 sm:$0xff]   ;;  %v1684_v21 = vld [vmem:[%s2529_s1 + $0x190] ss:$8 sps:$4 sm:$0xff]   ;;  %v1438_v48 = vcombine.low %v2001_v13, %v2001_v13 }
   0x8   :  { %884 = vmatprep.subr.bf16.mxu0 %v1661_v4  ;;  %v1685_v22 = vld [vmem:[%s2529_s1 + $0x1a4] ss:$8 sps:$4 sm:$0xff]   ;;  %v1687_v23 = vld [vmem:[%s2529_s1 + $0x1a0] ss:$8 sps:$4 sm:$0xff]   ;;  %v1688_v24 = vld [vmem:[%s2529_s1 + $0x1b4] ss:$8 sps:$4 sm:$0xff]  }
   0x9   :  { %912 = vmatprep.mubr.bf16.mxu0 %v1439_v14  ;;  %v1750_v25 = vld [vmem:[%s2529_s1 + $0x4] ss:$8 sps:$4 sm:$0xff]   ;;  %v1752_v26 = vld [vmem:[%s2529_s1] ss:$8 sps:$4 sm:$0xff]   ;;  %v1690_v27 = vld [vmem:[%s2529_s1 + $0x1b0] ss:$8 sps:$4 sm:$0xff]  }
   0xa   :  { %v1691_v28 = vld [vmem:[%s2529_s1 + $0x1c4] ss:$8 sps:$4 sm:$0xff]   ;;  %839 = vmatprep.subr.bf16.mxu1 %v1750_v25  ;;  %v1756_v29 = vld [vmem:[%s2529_s1 + $0x14] ss:$8 sps:$4 sm:$0xff]   ;;  %v1758_v30 = vld [vmem:[%s2529_s1 + $0x10] ss:$8 sps:$4 sm:$0xff]  }
   0xb   :  { %885 = vmatpush1.bf16.msra.mxu0 %v1663_v5  ;;  %840 = vmatpush1.bf16.msra.mxu1 %v1752_v26  ;;  %v1693_v31 = vld [vmem:[%s2529_s1 + $0x1c0] ss:$8 sps:$4 sm:$0xff]   ;;  %v1694_v32 = vld [vmem:[%s2529_s1 + $0x1d4] ss:$8 sps:$4 sm:$0xff]   ;;  %v1764_v33 = vld [vmem:[%s2529_s1 + $0x24] ss:$8 sps:$4 sm:$0xff]  }
   0xc   :  { %886 = vmatprep.subr.bf16.mxu0 %v1664_v6  ;;  %841 = vmatprep.subr.bf16.mxu1 %v1756_v29  ;;  %v1766_v34 = vld [vmem:[%s2529_s1 + $0x20] ss:$8 sps:$4 sm:$0xff]   ;;  %v1770_v35 = vld [vmem:[%s2529_s1 + $0x34] ss:$8 sps:$4 sm:$0xff]   ;;  %v1696_v36 = vld [vmem:[%s2529_s1 + $0x1d0] ss:$8 sps:$4 sm:$0xff]  }
   0xd   :  { %v1697_v37 = vld [vmem:[%s2529_s1 + $0x1e4] ss:$8 sps:$4 sm:$0xff]   ;;  %v1772_v38 = vld [vmem:[%s2529_s1 + $0x30] ss:$8 sps:$4 sm:$0xff]   ;;  %v1699_v40 = vld [vmem:[%s2529_s1 + $0x1e0] ss:$8 sps:$4 sm:$0xff]  }
   0xe   :  { %v1776_v39 = vld [vmem:[%s2529_s1 + $0x44] ss:$8 sps:$4 sm:$0xff]   ;;  %v1700_v41 = vld [vmem:[%s2529_s1 + $0x1f4] ss:$8 sps:$4 sm:$0xff]   ;;  %v1778_v42 = vld [vmem:[%s2529_s1 + $0x40] ss:$8 sps:$4 sm:$0xff]  }
   0xf   :  { %887 = vmatpush1.bf16.msra.mxu0 %v1666_v7  ;;  %842 = vmatpush1.bf16.msra.mxu1 %v1758_v30  ;;  %v1782_v43 = vld [vmem:[%s2529_s1 + $0x54] ss:$8 sps:$4 sm:$0xff]   ;;  %v1702_v44 = vld [vmem:[%s2529_s1 + $0x1f0] ss:$8 sps:$4 sm:$0xff]   ;;  %v1707_v45 = vld [vmem:[%s2529_s1 + $0x204] ss:$8 sps:$4 sm:$0xff]  }
  0x10   :  { %888 = vmatprep.subr.bf16.mxu0 %v1667_v8  ;;  %843 = vmatprep.subr.bf16.mxu1 %v1764_v33  ;;  %v2101_v46 = vld [vmem:[%s2530_s0 + $0x10] sm:$0xff]  ;;  %v1788_v49 = vld [vmem:[%s2529_s1 + $0x64] ss:$8 sps:$4 sm:$0xff]   ;;  %v1705_v50 = vld [vmem:[%s2529_s1 + $0x200] ss:$8 sps:$4 sm:$0xff]  }
  0x11   :  { %v1784_v47 = vld [vmem:[%s2529_s1 + $0x50] ss:$8 sps:$4 sm:$0xff]   ;;  %v1441_v51 = vcombine.high %v2101_v46, %v2101_v46  ;;  %v1710_v52 = vld [vmem:[%s2529_s1 + $0x214] ss:$8 sps:$4 sm:$0xff]   ;;  %v1790_v53 = vld [vmem:[%s2529_s1 + $0x60] ss:$8 sps:$4 sm:$0xff]  }
  0x12   :  { %v1794_v54 = vld [vmem:[%s2529_s1 + $0x74] ss:$8 sps:$4 sm:$0xff]   ;;  %v1708_v55 = vld [vmem:[%s2529_s1 + $0x210] ss:$8 sps:$4 sm:$0xff]   ;;  %v1713_v56 = vld [vmem:[%s2529_s1 + $0x224] ss:$8 sps:$4 sm:$0xff]  }
  0x13   :  { %889 = vmatpush1.bf16.msra.mxu0 %v1669_v9  ;;  %844 = vmatpush1.bf16.msra.mxu1 %v1766_v34  ;;  %v1796_v57 = vld [vmem:[%s2529_s1 + $0x70] ss:$8 sps:$4 sm:$0xff]   ;;  %v1800_v58 = vld [vmem:[%s2529_s1 + $0x84] ss:$8 sps:$4 sm:$0xff]   ;;  %v1711_v59 = vld [vmem:[%s2529_s1 + $0x220] ss:$8 sps:$4 sm:$0xff]  }
  0x14   :  { %890 = vmatprep.subr.bf16.mxu0 %v1670_v10  ;;  %845 = vmatprep.subr.bf16.mxu1 %v1770_v35  ;;  %v1716_v60 = vld [vmem:[%s2529_s1 + $0x234] ss:$8 sps:$4 sm:$0xff]   ;;  %v1802_v61 = vld [vmem:[%s2529_s1 + $0x80] ss:$8 sps:$4 sm:$0xff]   ;;  %v1714_v63 = vld [vmem:[%s2529_s1 + $0x230] ss:$8 sps:$4 sm:$0xff]  }
  0x15   :  { %v1806_v62 = vld [vmem:[%s2529_s1 + $0x94] ss:$8 sps:$4 sm:$0xff]   ;;  %v1719_v0 = vld [vmem:[%s2529_s1 + $0x244] ss:$8 sps:$4 sm:$0xff]   ;;  %v1808_v1 = vld [vmem:[%s2529_s1 + $0x90] ss:$8 sps:$4 sm:$0xff]  }
  0x16   :  { %v1812_v2 = vld [vmem:[%s2529_s1 + $0xa4] ss:$8 sps:$4 sm:$0xff]   ;;  %v1717_v3 = vld [vmem:[%s2529_s1 + $0x240] ss:$8 sps:$4 sm:$0xff]   ;;  %v1722_v4 = vld [vmem:[%s2529_s1 + $0x254] ss:$8 sps:$4 sm:$0xff]  }
  0x17   :  { %891 = vmatpush1.bf16.msra.mxu0 %v1672_v11  ;;  %846 = vmatpush1.bf16.msra.mxu1 %v1772_v38  ;;  %v1814_v5 = vld [vmem:[%s2529_s1 + $0xa0] ss:$8 sps:$4 sm:$0xff]   ;;  %v1818_v6 = vld [vmem:[%s2529_s1 + $0xb4] ss:$8 sps:$4 sm:$0xff]   ;;  %v1720_v7 = vld [vmem:[%s2529_s1 + $0x250] ss:$8 sps:$4 sm:$0xff]  }
  0x18   :  { %892 = vmatprep.subr.bf16.mxu0 %v1673_v12  ;;  %847 = vmatprep.subr.bf16.mxu1 %v1776_v39  ;;  %v1725_v8 = vld [vmem:[%s2529_s1 + $0x264] ss:$8 sps:$4 sm:$0xff]   ;;  %v1820_v10 = vld [vmem:[%s2529_s1 + $0xb0] ss:$8 sps:$4 sm:$0xff]   ;;  %v1723_v13 = vld [vmem:[%s2529_s1 + $0x260] ss:$8 sps:$4 sm:$0xff]  }
  0x19   :  { %v27_v9 = vld [vmem:[%s2530_s0] sm:$0xff]  ;;  %v1728_v14 = vld [vmem:[%s2529_s1 + $0x274] ss:$8 sps:$4 sm:$0xff]   ;;  %v1732_v25 = vld [vmem:[%s2529_s1 + $0x290] ss:$8 sps:$4 sm:$0xff]  }
  0x1a   :  { %v1437_v11 = vcombine.high %v27_v9, %v27_v9  ;;  %v1824_v12 = vld [vmem:[%s2529_s1 + $0xc4] ss:$8 sps:$4 sm:$0xff]   ;;  %v1735_v29 = vld [vmem:[%s2529_s1 + $0x2a0] ss:$8 sps:$4 sm:$0xff]   ;;  %v1740_v30 = vld [vmem:[%s2529_s1 + $0x2b4] ss:$8 sps:$4 sm:$0xff]  }
  0x1b   :  { %893 = vmatpush1.bf16.msra.mxu0 %v1675_v15  ;;  %848 = vmatpush1.bf16.msra.mxu1 %v1778_v42  ;;  %v1826_v15 = vld [vmem:[%s2529_s1 + $0xc0] ss:$8 sps:$4 sm:$0xff]   ;;  %v1737_v26 = vld [vmem:[%s2529_s1 + $0x2a4] ss:$8 sps:$4 sm:$0xff]   ;;  %v1860_v33 = vld [vmem:[%s2531_s3 + $0x14] ss:$8 sps:$4 sm:$0xff]  }
  0x1c   :  { %894 = vmatprep.subr.bf16.mxu0 %v1676_v16  ;;  %849 = vmatprep.subr.bf16.mxu1 %v1782_v43  ;;  %v1830_v16 = vld [vmem:[%s2529_s1 + $0xd4] ss:$8 sps:$4 sm:$0xff]   ;;  %v1738_v34 = vld [vmem:[%s2529_s1 + $0x2b0] ss:$8 sps:$4 sm:$0xff]   ;;  %v1743_v35 = vld [vmem:[%s2529_s1 + $0x2c4] ss:$8 sps:$4 sm:$0xff]  }
  0x1d   :  { %871 = vmatprep.mubr.bf16.mxu1 %v1437_v11  ;;  %v1741_v38 = vld [vmem:[%s2529_s1 + $0x2c0] ss:$8 sps:$4 sm:$0xff]   ;;  %v1746_v39 = vld [vmem:[%s2529_s1 + $0x2d4] ss:$8 sps:$4 sm:$0xff]   ;;  %v1744_v42 = vld [vmem:[%s2529_s1 + $0x2d0] ss:$8 sps:$4 sm:$0xff]  }
  0x1e   :  { %v1749_v43 = vld [vmem:[%s2529_s1 + $0x2e4] ss:$8 sps:$4 sm:$0xff]   ;;  %v1885_v11 = vld [vmem:[%s2531_s3 + $0xa0] ss:$8 sps:$4 sm:$0xff]  }
  0x1f   :  { %895 = vmatpush1.bf16.msra.mxu0 %v1678_v17  ;;  %850 = vmatpush1.bf16.msra.mxu1 %v1784_v47  ;;  %v1726_v17 = vld [vmem:[%s2529_s1 + $0x270] ss:$8 sps:$4 sm:$0xff]   ;;  %v1747_v47 = vld [vmem:[%s2529_s1 + $0x2e0] ss:$8 sps:$4 sm:$0xff]  }
  0x20   :  { %896 = vmatprep.subr.bf16.mxu0 %v1679_v18  ;;  %851 = vmatprep.subr.bf16.mxu1 %v1788_v49  ;;  %v1731_v18 = vld [vmem:[%s2529_s1 + $0x284] ss:$8 sps:$4 sm:$0xff]   ;;  %v1867_v49 = vld [vmem:[%s2531_s3 + $0x40] ss:$8 sps:$4 sm:$0xff]  }
  0x23   :  { %897 = vmatpush1.bf16.msra.mxu0 %v1681_v19  ;;  %852 = vmatpush1.bf16.msra.mxu1 %v1790_v53  ;;  %v1832_v19 = vld [vmem:[%s2529_s1 + $0xd0] ss:$8 sps:$4 sm:$0xff]  }
  0x24   :  { %898 = vmatprep.subr.bf16.mxu0 %v1682_v20  ;;  %853 = vmatprep.subr.bf16.mxu1 %v1794_v54  ;;  %v1836_v20 = vld [vmem:[%s2529_s1 + $0xe4] ss:$8 sps:$4 sm:$0xff]   ;;  %v2305_v53 = vld [vmem:[%s2530_s0 + $0x18] sm:$0xff] }
  0x25   :  { %v1870_v54 = vld [vmem:[%s2531_s3 + $0x50] ss:$8 sps:$4 sm:$0xff]  }
  0x27   :  { %899 = vmatpush1.bf16.msra.mxu0 %v1684_v21  ;;  %854 = vmatpush1.bf16.msra.mxu1 %v1796_v57  ;;  %v1729_v21 = vld [vmem:[%s2529_s1 + $0x280] ss:$8 sps:$4 sm:$0xff]  }
  0x28   :  { %900 = vmatprep.subr.bf16.mxu0 %v1685_v22  ;;  %855 = vmatprep.subr.bf16.mxu1 %v1800_v58  ;;  %v1734_v22 = vld [vmem:[%s2529_s1 + $0x294] ss:$8 sps:$4 sm:$0xff]   ;;  %v1761_v57 = vld [vmem:[%s2529_s1 + $0x300] ss:$8 sps:$4 sm:$0xff]   ;;  %v1443_v58 = vcombine.high %v2305_v53, %v2305_v53 }
  0x2b   :  { %901 = vmatpush1.bf16.msra.mxu0 %v1687_v23  ;;  %856 = vmatpush1.bf16.msra.mxu1 %v1802_v61  ;;  %v1838_v23 = vld [vmem:[%s2529_s1 + $0xe0] ss:$8 sps:$4 sm:$0xff]   ;;  %v1767_v61 = vld [vmem:[%s2529_s1 + $0x310] ss:$8 sps:$4 sm:$0xff]  }
  0x2c   :  { %902 = vmatprep.subr.bf16.mxu0 %v1688_v24  ;;  %857 = vmatprep.subr.bf16.mxu1 %v1806_v62  ;;  %v1842_v24 = vld [vmem:[%s2529_s1 + $0xf4] ss:$8 sps:$4 sm:$0xff]   ;;  %v1775_v62 = vld [vmem:[%s2529_s1 + $0x324] ss:$8 sps:$4 sm:$0xff]  }
  0x2f   :  { %903 = vmatpush1.bf16.msra.mxu0 %v1690_v27  ;;  %858 = vmatpush1.bf16.msra.mxu1 %v1808_v1  ;;  %v1844_v27 = vld [vmem:[%s2529_s1 + $0xf0] ss:$8 sps:$4 sm:$0xff]   ;;  %v1773_v1 = vld [vmem:[%s2529_s1 + $0x320] ss:$8 sps:$4 sm:$0xff]  }
  0x30   :  { %904 = vmatprep.subr.bf16.mxu0 %v1691_v28  ;;  %859 = vmatprep.subr.bf16.mxu1 %v1812_v2  ;;  %v1857_v28 = vld [vmem:[%s2531_s3 + $0x4] ss:$8 sps:$4 sm:$0xff]   ;;  %v1781_v2 = vld [vmem:[%s2529_s1 + $0x334] ss:$8 sps:$4 sm:$0xff]  }
  0x33   :  { %905 = vmatpush1.bf16.msra.mxu0 %v1693_v31  ;;  %860 = vmatpush1.bf16.msra.mxu1 %v1814_v5  ;;  %v1436_v31 = vcombine.low %v27_v9, %v27_v9  ;;  %v1779_v5 = vld [vmem:[%s2529_s1 + $0x330] ss:$8 sps:$4 sm:$0xff]   ;;  %v1785_v9 = vld [vmem:[%s2529_s1 + $0x340] ss:$8 sps:$4 sm:$0xff]  }
  0x34   :  { %906 = vmatprep.subr.bf16.mxu0 %v1694_v32  ;;  %861 = vmatprep.subr.bf16.mxu1 %v1818_v6  ;;  %v1855_v32 = vld [vmem:[%s2531_s3] ss:$8 sps:$4 sm:$0xff]   ;;  %v1787_v6 = vld [vmem:[%s2529_s1 + $0x344] ss:$8 sps:$4 sm:$0xff]  }
  0x37   :  { %907 = vmatpush1.bf16.msra.mxu0 %v1696_v36  ;;  %862 = vmatpush1.bf16.msra.mxu1 %v1820_v10  ;;  %v1858_v36 = vld [vmem:[%s2531_s3 + $0x10] ss:$8 sps:$4 sm:$0xff]   ;;  %v1793_v10 = vld [vmem:[%s2529_s1 + $0x354] ss:$8 sps:$4 sm:$0xff]  }
  0x38   :  { %908 = vmatprep.subr.bf16.mxu0 %v1697_v37  ;;  %863 = vmatprep.subr.bf16.mxu1 %v1824_v12  ;;  %v1863_v37 = vld [vmem:[%s2531_s3 + $0x24] ss:$8 sps:$4 sm:$0xff]   ;;  %v1890_v12 = vld [vmem:[%s2531_s3 + $0xb4] ss:$8 sps:$4 sm:$0xff]  }
  0x3b   :  { %909 = vmatpush1.bf16.msra.mxu0 %v1699_v40  ;;  %864 = vmatpush1.bf16.msra.mxu1 %v1826_v15  ;;  %v1861_v40 = vld [vmem:[%s2531_s3 + $0x20] ss:$8 sps:$4 sm:$0xff]   ;;  %v1888_v15 = vld [vmem:[%s2531_s3 + $0xb0] ss:$8 sps:$4 sm:$0xff]  }
  0x3c   :  { %910 = vmatprep.subr.bf16.mxu0 %v1700_v41  ;;  %865 = vmatprep.subr.bf16.mxu1 %v1830_v16  ;;  %v1866_v41 = vld [vmem:[%s2531_s3 + $0x34] ss:$8 sps:$4 sm:$0xff]   ;;  %v1893_v16 = vld [vmem:[%s2531_s3 + $0xc4] ss:$8 sps:$4 sm:$0xff]  }
  0x3f   :  { %911 = vmatpush1.bf16.msra.mxu0 %v1702_v44  ;;  %866 = vmatpush1.bf16.msra.mxu1 %v1832_v19  ;;  %v1864_v44 = vld [vmem:[%s2531_s3 + $0x30] ss:$8 sps:$4 sm:$0xff]   ;;  %v1891_v19 = vld [vmem:[%s2531_s3 + $0xc0] ss:$8 sps:$4 sm:$0xff]  }
  0x40   :  { %921 = vmatprep.subr.bf16.mxu0 %v1707_v45  ;;  %867 = vmatprep.subr.bf16.mxu1 %v1836_v20  ;;  %v1869_v45 = vld [vmem:[%s2531_s3 + $0x44] ss:$8 sps:$4 sm:$0xff]   ;;  %v1803_v20 = vld [vmem:[%s2529_s1 + $0x370] ss:$8 sps:$4 sm:$0xff]  }
  0x42   :  { %913 = vmatmul.mubr.bf16.vlgmr.msra.gmra.mrb[0].mxu0 %v1438_v48  ;;  %v1755_v48 = vld [vmem:[%s2529_s1 + $0x2f4] ss:$8 sps:$4 sm:$0xff]  }
  0x43   :  { %922 = vmatpush1.bf16.msra.mxu0 %v1705_v50  ;;  %953 = vmatprep.mubr.bf16.mxu0 %v1441_v51  ;;  %v1872_v50 = vld [vmem:[%s2531_s3 + $0x54] ss:$8 sps:$4 sm:$0xff]   ;;  %v1753_v51 = vld [vmem:[%s2529_s1 + $0x2f0] ss:$8 sps:$4 sm:$0xff]  }
  0x44   :  { %923 = vmatprep.subr.bf16.mxu0 %v1710_v52  ;;  %868 = vmatpush1.bf16.msra.mxu1 %v1838_v23  ;;  %v1763_v52 = vld [vmem:[%s2529_s1 + $0x304] ss:$8 sps:$4 sm:$0xff]   ;;  %v1817_v23 = vld [vmem:[%s2529_s1 + $0x394] ss:$8 sps:$4 sm:$0xff]  }
  0x45   :  { %869 = vmatprep.subr.bf16.mxu1 %v1842_v24  ;;  %v1815_v24 = vld [vmem:[%s2529_s1 + $0x390] ss:$8 sps:$4 sm:$0xff]  }
  0x47   :  { %924 = vmatpush1.bf16.msra.mxu0 %v1708_v55  ;;  %v1440_v55 = vcombine.low %v2101_v46, %v2101_v46  ;;  %v1873_v46 = vld [vmem:[%s2531_s3 + $0x60] ss:$8 sps:$4 sm:$0xff]  }
  0x48   :  { %925 = vmatprep.subr.bf16.mxu0 %v1713_v56  ;;  %870 = vmatpush1.bf16.msra.mxu1 %v1844_v27  ;;  %v1875_v56 = vld [vmem:[%s2531_s3 + $0x64] ss:$8 sps:$4 sm:$0xff]   ;;  %v1829_v27 = vld [vmem:[%s2529_s1 + $0x3b4] ss:$8 sps:$4 sm:$0xff]  }
  0x49   :  { %1211 = vmatprep.subr.bf16.mxu1 %v1857_v28  ;;  %v1827_v28 = vld [vmem:[%s2529_s1 + $0x3b0] ss:$8 sps:$4 sm:$0xff]  }
  0x4b   :  { %926 = vmatpush1.bf16.msra.mxu0 %v1711_v59  ;;  %872 = vmatmul.mubr.bf16.vlgmr.msra.gmra.mrb[0].mxu1 %v1436_v31  ;;  %v1769_v59 = vld [vmem:[%s2529_s1 + $0x314] ss:$8 sps:$4 sm:$0xff]  }
  0x4c   :  { %927 = vmatprep.subr.bf16.mxu0 %v1716_v60  ;;  %1212 = vmatpush1.bf16.msra.mxu1 %v1855_v32  ;;  %v1878_v60 = vld [vmem:[%s2531_s3 + $0x74] ss:$8 sps:$4 sm:$0xff]   ;;  %v1839_v32 = vld [vmem:[%s2529_s1 + $0x3d0] ss:$8 sps:$4 sm:$0xff]  }
  0x4d   :  { %1213 = vmatprep.subr.bf16.mxu1 %v1860_v33  ;;  %v1841_v31 = vld [vmem:[%s2529_s1 + $0x3d4] ss:$8 sps:$4 sm:$0xff]   ;;  %v1847_v33 = vld [vmem:[%s2529_s1 + $0x3e4] ss:$8 sps:$4 sm:$0xff]  }
  0x4f   :  { %928 = vmatpush1.bf16.msra.mxu0 %v1714_v63  ;;  %v1876_v63 = vld [vmem:[%s2531_s3 + $0x70] ss:$8 sps:$4 sm:$0xff]  }
  0x50   :  { %929 = vmatprep.subr.bf16.mxu0 %v1719_v0  ;;  %1214 = vmatpush1.bf16.msra.mxu1 %v1858_v36  ;;  %v1881_v0 = vld [vmem:[%s2531_s3 + $0x84] ss:$8 sps:$4 sm:$0xff]   ;;  %v1850_v36 = vld [vmem:[%s2529_s1 + $0x3f0] ss:$8 sps:$4 sm:$0xff]  }
  0x51   :  { %1215 = vmatprep.subr.bf16.mxu1 %v1863_v37  ;;  %v1442_v37 = vcombine.low %v2305_v53, %v2305_v53  ;;  %v159_v53 = vld [vmem:[%s2533_s2] sm:$0x3] }
  0x53   :  { %930 = vmatpush1.bf16.msra.mxu0 %v1717_v3  ;;  %v1879_v3 = vld [vmem:[%s2531_s3 + $0x80] ss:$8 sps:$4 sm:$0xff]  }
  0x54   :  { %931 = vmatprep.subr.bf16.mxu0 %v1722_v4  ;;  %1216 = vmatpush1.bf16.msra.mxu1 %v1861_v40  ;;  %v1884_v4 = vld [vmem:[%s2531_s3 + $0x94] ss:$8 sps:$4 sm:$0xff]   ;;  %v1899_v40 = vld [vmem:[%s2531_s3 + $0xe4] ss:$8 sps:$4 sm:$0xff]  }
  0x55   :  { %1217 = vmatprep.subr.bf16.mxu1 %v1866_v41  ;;  %v1897_v41 = vld [vmem:[%s2531_s3 + $0xe0] ss:$8 sps:$4 sm:$0xff]  }
  0x57   :  { %932 = vmatpush1.bf16.msra.mxu0 %v1720_v7  ;;  %v1882_v7 = vld [vmem:[%s2531_s3 + $0x90] ss:$8 sps:$4 sm:$0xff]  }
  0x58   :  { %933 = vmatprep.subr.bf16.mxu0 %v1725_v8  ;;  %1218 = vmatpush1.bf16.msra.mxu1 %v1864_v44  ;;  %v1887_v8 = vld [vmem:[%s2531_s3 + $0xa4] ss:$8 sps:$4 sm:$0xff]  }
  0x59   :  { %1219 = vmatprep.subr.bf16.mxu1 %v1869_v45  ;;  %v1903_v44 = vld [vmem:[%s2532_s5 + $0x40] sm:$0xff]  }
  0x5b   :  { %934 = vmatpush1.bf16.msra.mxu0 %v1723_v13  ;;  %v1791_v13 = vld [vmem:[%s2529_s1 + $0x350] ss:$8 sps:$4 sm:$0xff]  }
  0x5c   :  { %935 = vmatprep.subr.bf16.mxu0 %v1728_v14  ;;  %1220 = vmatpush1.bf16.msra.mxu1 %v1867_v49  ;;  %v1799_v14 = vld [vmem:[%s2529_s1 + $0x364] ss:$8 sps:$4 sm:$0xff]  }
  0x5d   :  { %1221 = vmatprep.subr.bf16.mxu1 %v1872_v50  ;;  %v161_v50 = vlaneseq }
  0x5f   :  { %936 = vmatpush1.bf16.msra.mxu0 %v1726_v17  ;;  %v1797_v17 = vld [vmem:[%s2529_s1 + $0x360] ss:$8 sps:$4 sm:$0xff]  }
  0x60   :  { %937 = vmatprep.subr.bf16.mxu0 %v1731_v18  ;;  %1222 = vmatpush1.bf16.msra.mxu1 %v1870_v54  ;;  %v1805_v18 = vld [vmem:[%s2529_s1 + $0x374] ss:$8 sps:$4 sm:$0xff]  }
  0x61   :  { %1223 = vmatprep.subr.bf16.mxu1 %v1875_v56 }
  0x63   :  { %938 = vmatpush1.bf16.msra.mxu0 %v1729_v21  ;;  %v1811_v21 = vld [vmem:[%s2529_s1 + $0x384] ss:$8 sps:$4 sm:$0xff]  }
  0x64   :  { %939 = vmatprep.subr.bf16.mxu0 %v1734_v22  ;;  %1224 = vmatpush1.bf16.msra.mxu1 %v1873_v46  ;;  %v1809_v22 = vld [vmem:[%s2529_s1 + $0x380] ss:$8 sps:$4 sm:$0xff]  }
  0x65   :  { %1225 = vmatprep.subr.bf16.mxu1 %v1878_v60 }
  0x67   :  { %940 = vmatpush1.bf16.msra.mxu0 %v1732_v25  ;;  %v1823_v25 = vld [vmem:[%s2529_s1 + $0x3a4] ss:$8 sps:$4 sm:$0xff]  }
  0x68   :  { %941 = vmatprep.subr.bf16.mxu0 %v1737_v26  ;;  %1226 = vmatpush1.bf16.msra.mxu1 %v1876_v63  ;;  %v1821_v26 = vld [vmem:[%s2529_s1 + $0x3a0] ss:$8 sps:$4 sm:$0xff]  }
  0x69   :  { %1227 = vmatprep.subr.bf16.mxu1 %v1881_v0 }
  0x6b   :  { %942 = vmatpush1.bf16.msra.mxu0 %v1735_v29  ;;  %v1835_v29 = vld [vmem:[%s2529_s1 + $0x3c4] ss:$8 sps:$4 sm:$0xff]  }
  0x6c   :  { %943 = vmatprep.subr.bf16.mxu0 %v1740_v30  ;;  %1228 = vmatpush1.bf16.msra.mxu1 %v1879_v3  ;;  %v1833_v30 = vld [vmem:[%s2529_s1 + $0x3c0] ss:$8 sps:$4 sm:$0xff]  }
  0x6d   :  { %1229 = vmatprep.subr.bf16.mxu1 %v1884_v4  ;;  %v1904_v3 = vld [vmem:[%s2532_s5] sm:$0xff]  }
  0x6f   :  { %944 = vmatpush1.bf16.msra.mxu0 %v1738_v34  ;;  %v1845_v34 = vld [vmem:[%s2529_s1 + $0x3e0] ss:$8 sps:$4 sm:$0xff]  }
  0x70   :  { %945 = vmatprep.subr.bf16.mxu0 %v1743_v35  ;;  %1230 = vmatpush1.bf16.msra.mxu1 %v1882_v7  ;;  %v1852_v35 = vld [vmem:[%s2529_s1 + $0x3f4] ss:$8 sps:$4 sm:$0xff]  }
  0x71   :  { %1231 = vmatprep.subr.bf16.mxu1 %v1887_v8  ;;  %v1907_v7 = vld [vmem:[%s2532_s5 + $0x50] sm:$0xff]  }
  0x72   :  { %v1908_v8 = vld [vmem:[%s2532_s5 + $0x10] sm:$0xff]  }
  0x73   :  { %946 = vmatpush1.bf16.msra.mxu0 %v1741_v38  ;;  %v1894_v38 = vld [vmem:[%s2531_s3 + $0xd0] ss:$8 sps:$4 sm:$0xff]  }
  0x74   :  { %947 = vmatprep.subr.bf16.mxu0 %v1746_v39  ;;  %1232 = vmatpush1.bf16.msra.mxu1 %v1885_v11  ;;  %v1896_v39 = vld [vmem:[%s2531_s3 + $0xd4] ss:$8 sps:$4 sm:$0xff]   ;;  %v1911_v11 = vld [vmem:[%s2532_s5 + $0x60] sm:$0xff]  }
  0x75   :  { %1233 = vmatprep.subr.bf16.mxu1 %v1890_v12  ;;  %v1912_v12 = vld [vmem:[%s2532_s5 + $0x20] sm:$0xff]  }
  0x77   :  { %948 = vmatpush1.bf16.msra.mxu0 %v1744_v42  ;;  %v1902_v42 = vld [vmem:[%s2531_s3 + $0xf4] ss:$8 sps:$4 sm:$0xff]  }
  0x78   :  { %949 = vmatprep.subr.bf16.mxu0 %v1749_v43  ;;  %1234 = vmatpush1.bf16.msra.mxu1 %v1888_v15  ;;  %v1900_v43 = vld [vmem:[%s2531_s3 + $0xf0] ss:$8 sps:$4 sm:$0xff]  }
  0x79   :  { %1235 = vmatprep.subr.bf16.mxu1 %v1893_v16  ;;  %v1915_v15 = vld [vmem:[%s2532_s5 + $0x70] sm:$0xff]  }
  0x7a   :  { %v1916_v16 = vld [vmem:[%s2532_s5 + $0x30] sm:$0xff]  }
  0x7b   :  { %950 = vmatpush1.bf16.msra.mxu0 %v1747_v47 }
  0x7c   :  { %951 = vmatprep.subr.bf16.mxu0 %v1755_v48  ;;  %1236 = vmatpush1.bf16.msra.mxu1 %v1891_v19  ;;  %v1039_v19 = vld [vmem:[%s2534_s4] sm:$0x3] }
  0x7d   :  { %1237 = vmatprep.subr.bf16.mxu1 %v1896_v39 }
  0x7f   :  { %952 = vmatpush1.bf16.msra.mxu0 %v1753_v51  ;;  %v162_v51 = vshrl.u32 %v161_v50, 7 }
  0x80   :  { %962 = vmatprep.subr.bf16.mxu0 %v1763_v52  ;;  %1238 = vmatpush1.bf16.msra.mxu1 %v1894_v38 }
  0x81   :  { %1239 = vmatprep.subr.bf16.mxu1 %v1899_v40  ;;  %v163_v52 = vsub.s32 0, %v162_v51  ;;  %v167_v54 = vsub.s32 1, %v162_v51 }
  0x82   :  { %954 = vmatmul.mubr.bf16.vlgmr.msra.gmra.mrb[0].mxu0 %v1440_v55 }
  0x83   :  { %963 = vmatpush1.bf16.msra.mxu0 %v1761_v57  ;;  %994 = vmatprep.mubr.bf16.mxu0 %v1443_v58  ;;  %v164_v55 = vrot.slane %v159_v53, %v163_v52  ;;  %v168_v56 = vrot.slane %v159_v53, %v167_v54 }
  0x84   :  { %964 = vmatprep.subr.bf16.mxu0 %v1769_v59  ;;  %1240 = vmatpush1.bf16.msra.mxu1 %v1897_v41 }
  0x85   :  { %1241 = vmatprep.subr.bf16.mxu1 %v1902_v42 }
  0x87   :  { %965 = vmatpush1.bf16.msra.mxu0 %v1767_v61 }
  0x88   :  { %966 = vmatprep.subr.bf16.mxu0 %v1775_v62  ;;  %1242 = vmatpush1.bf16.msra.mxu1 %v1900_v43 }
  0x89   :  { %1621 = vmatprep.subr.bf16.mxu1 %v1903_v44 }
  0x8b   :  { %967 = vmatpush1.bf16.msra.mxu0 %v1773_v1 }
  0x8c   :  { %968 = vmatprep.subr.bf16.mxu0 %v1781_v2 }
  0x8f   :  { %969 = vmatpush1.bf16.msra.mxu0 %v1779_v5  ;;  %v1905_v5 = vld [vmem:[%s2532_s5 + $0x48] sm:$0xff]  }
  0x90   :  { %970 = vmatprep.subr.bf16.mxu0 %v1787_v6  ;;  %v1906_v6 = vld [vmem:[%s2532_s5 + $0x8] sm:$0xff]  }
  0x93   :  { %971 = vmatpush1.bf16.msra.mxu0 %v1785_v9  ;;  %v1909_v9 = vld [vmem:[%s2532_s5 + $0x58] sm:$0xff]  }
  0x94   :  { %972 = vmatprep.subr.bf16.mxu0 %v1793_v10  ;;  %v1910_v10 = vld [vmem:[%s2532_s5 + $0x18] sm:$0xff]  }
  0x97   :  { %973 = vmatpush1.bf16.msra.mxu0 %v1791_v13  ;;  %v1913_v13 = vld [vmem:[%s2532_s5 + $0x68] sm:$0xff]  }
  0x98   :  { %974 = vmatprep.subr.bf16.mxu0 %v1799_v14  ;;  %v1914_v14 = vld [vmem:[%s2532_s5 + $0x28] sm:$0xff]  }
  0x9b   :  { %975 = vmatpush1.bf16.msra.mxu0 %v1797_v17  ;;  %v1917_v17 = vld [vmem:[%s2532_s5 + $0x78] sm:$0xff]  }
  0x9c   :  { %976 = vmatprep.subr.bf16.mxu0 %v1805_v18  ;;  %v1918_v18 = vld [vmem:[%s2532_s5 + $0x38] sm:$0xff]  }
  0x9f   :  { %977 = vmatpush1.bf16.msra.mxu0 %v1803_v20  ;;  %v1044_v20 = vrot.slane %v1039_v19, %v163_v52 }
  0xa0   :  { %978 = vmatprep.subr.bf16.mxu0 %v1811_v21  ;;  %v1048_v21 = vrot.slane %v1039_v19, %v167_v54 }
  0xa3   :  { %979 = vmatpush1.bf16.msra.mxu0 %v1809_v22 }
  0xa4   :  { %980 = vmatprep.subr.bf16.mxu0 %v1817_v23 }
  0xa7   :  { %981 = vmatpush1.bf16.msra.mxu0 %v1815_v24 }
  0xa8   :  { %982 = vmatprep.subr.bf16.mxu0 %v1823_v25 }
  0xab   :  { %983 = vmatpush1.bf16.msra.mxu0 %v1821_v26 }
  0xac   :  { %984 = vmatprep.subr.bf16.mxu0 %v1829_v27 }
  0xaf   :  { %985 = vmatpush1.bf16.msra.mxu0 %v1827_v28 }
  0xb0   :  { %986 = vmatprep.subr.bf16.mxu0 %v1835_v29 }
  0xb3   :  { %987 = vmatpush1.bf16.msra.mxu0 %v1833_v30 }
  0xb4   :  { %988 = vmatprep.subr.bf16.mxu0 %v1841_v31 }
  0xb7   :  { %989 = vmatpush1.bf16.msra.mxu0 %v1839_v32 }
  0xb8   :  { %990 = vmatprep.subr.bf16.mxu0 %v1847_v33  ;;  %v1604_v33 = vld [vmem:[%s2535_s6] ss:$0 sm:$0xff] }
  0xbb   :  { %991 = vmatpush1.bf16.msra.mxu0 %v1845_v34 }
  0xbc   :  { %992 = vmatprep.subr.bf16.mxu0 %v1852_v35 }
  0xbf   :  { %993 = vmatpush1.bf16.msra.mxu0 %v1850_v36 }
  0xc2   :  { %995 = vmatmul.mubr.bf16.vlgmr.msra.gmra.mrb[0].mxu0 %v1442_v37 }
 0x11e   :  { %v873_v45 = vpop.f32.mrb[0].mxu1 }
 0x11f   :  { %v875_v47 = vpop.f32.mrb[1].mxu1  ;;  %v874_v57 = vadd.f32 %v873_v45, %v164_v55 }
 0x120   :  { %v877_v48 = vpop.f32.mrb[2].mxu1  ;;  %v876_v58 = vadd.f32 %v875_v47, %v168_v56 }
 0x121   :  { %v878_v49 = vpop.f32.mrb[3].mxu1 }
 0x195   :  { %v996_v59 = vpop.f32.mrb[0].mxu0 }
 0x196   :  { %v1644_v46 = vadd.f32 %v996_v59, %v874_v57  ;;  %v998_v60 = vpop.f32.mrb[1].mxu0 }
 0x197   :  { %v1646_v61 = vadd.f32 %v998_v60, %v876_v58  ;;  %v1000_v62 = vpop.f32.mrb[2].mxu0 }
 0x198   :  { %v1003_v63 = vmax.f32 %v1644_v46, 0.0  ;;  %v1001_v0 = vpop.f32.mrb[3].mxu0 }
 0x199   :  { %v1004_v1 = vmax.f32 %v1646_v61, 0.0 }
 0x19a   :  { %v1005_v4 = vpack.c.bf16 %v1003_v63, %v1003_v63 }
 0x19b   :  { %v1006_v2 = vpack.c.bf16 %v1004_v1, %v1004_v1 }
 0x19d   :  { %1243 = vmatprep.mubr.bf16.mxu1 %v1006_v2 }
 0x19e   :  { %1244 = vmatmul.mubr.bf16.vlgmr.msra.gmra.mrb[4].mxu1 %v1005_v4 }
 0x19f   :  { %1622 = vmatpush3.bf16.msra.mxu1 %v1904_v3 }
 0x1a0   :  { %1623 = vmatprep.subr.bf16.mxu1 %v1905_v5 }
 0x1a3   :  { %1624 = vmatpush3.bf16.msra.mxu1 %v1906_v6 }
 0x1a4   :  { %1625 = vmatprep.subr.bf16.mxu1 %v1907_v7 }
 0x1a7   :  { %1626 = vmatpush3.bf16.msra.mxu1 %v1908_v8 }
 0x1a8   :  { %1627 = vmatprep.subr.bf16.mxu1 %v1909_v9 }
 0x1ab   :  { %1628 = vmatpush3.bf16.msra.mxu1 %v1910_v10 }
 0x1ac   :  { %1629 = vmatprep.subr.bf16.mxu1 %v1911_v11 }
 0x1af   :  { %1630 = vmatpush3.bf16.msra.mxu1 %v1912_v12 }
 0x1b0   :  { %1631 = vmatprep.subr.bf16.mxu1 %v1913_v13 }
 0x1b3   :  { %1632 = vmatpush3.bf16.msra.mxu1 %v1914_v14 }
 0x1b4   :  { %1633 = vmatprep.subr.bf16.mxu1 %v1915_v15 }
 0x1b7   :  { %1634 = vmatpush3.bf16.msra.mxu1 %v1916_v16 }
 0x1b8   :  { %1635 = vmatprep.subr.bf16.mxu1 %v1917_v17 }
 0x1bb   :  { %1636 = vmatpush3.bf16.msra.mxu1 %v1918_v18 }
 0x271   :  { %v1245_v22 = vpop.f32.mrb[4].mxu1 }
 0x272   :  { %v1246_v23 = vadd.f32 %v1245_v22, %v1044_v20  ;;  %v1247_v24 = vpop.f32.mrb[5].mxu1 }
 0x273   :  { %v1248_v25 = vadd.f32 %v1247_v24, %v1048_v21  ;;  %v1249_v26 = vpop.f32.mrb[6].mxu1 }
 0x274   :  { %v1252_v27 = vmax.f32 %v1246_v23, 0.0  ;;  %v1250_v28 = vpop.f32.mrb[7].mxu1 }
 0x275   :  { %v1253_v29 = vmax.f32 %v1248_v25, 0.0 }
 0x276   :  { %v1254_v31 = vpack.c.bf16 %v1252_v27, %v1252_v27 }
 0x277   :  { %v1255_v30 = vpack.c.bf16 %v1253_v29, %v1253_v29 }
 0x279   :  { %1423 = vmatprep.mubr.bf16.mxu1 %v1255_v30 }
 0x27a   :  { %1424 = vmatmul.mubr.bf16.vlgmr.msra.gmra.mrb[8].mxu1 %v1254_v31 }
 0x34d   :  { %v1637_v32 = vpop.f32.mrb[8].mxu1 }
 0x34e   :  { %v1638_v34 = vpop.f32.mrb[9].mxu1 }
 0x34f   :  { %v1639_v35 = vadd.f32 %v1638_v34, %v1637_v32  ;;  %v1640_v36 = vpop.f32.mrb[10].mxu1 }
 0x350   :  { %v1641_v37 = vpop.f32.mrb[11].mxu1 }
 0x351   :  { %v1426_v38 = vadd.f32 %v1639_v35, %v1604_v33 }
 0x353   :  { %1431 = vst [vmem:[%s2536_s7] sm:$0xff] %v1426_v38 }

</bundles_post_ra>
